<compile_context>
chip_gen: v5e
topology: v5e:2x2
jax: 0.10.0
libtpu: 0.0.40
codegen_flags: <defaults>
</compile_context>

<pallas_src>
import jax
import jax.numpy as jnp
from jax.experimental import pallas as pl
from jax.experimental.pallas import tpu as pltpu


# ----------------------------------------------------------------------------
# Pallas kernel: fused 4-layer MLP + row softmax for one batch tile.
# ----------------------------------------------------------------------------
def robust_portfolio_kernel(
    x_ref,            # (TB, IN)        bf16
    w1_ref, b1_ref,   # (IN, 512) bf16, (1, 512) f32
    w2_ref, b2_ref,   # (512, 256) bf16, (1, 256) f32
    w3_ref, b3_ref,   # (256, 128) bf16, (1, 128) f32
    w4_ref, b4_ref,   # (128, OUT_PAD) bf16, (1, OUT_PAD) f32 (-1e30 on padded cols)
    o_ref,            # (TB, OUT_PAD)   f32
):
    x = x_ref[...]  # already bf16

    # fc1 -> (dropout: identity at eval) -> relu ; cast back to bf16 right away
    h = jnp.dot(x, w1_ref[...], preferred_element_type=jnp.float32) + b1_ref[...]
    h = jnp.maximum(h, 0.0).astype(jnp.bfloat16)

    # fc2 -> relu
    h = jnp.dot(h, w2_ref[...], preferred_element_type=jnp.float32) + b2_ref[...]
    h = jnp.maximum(h, 0.0).astype(jnp.bfloat16)

    # fc3 -> relu
    h = jnp.dot(h, w3_ref[...], preferred_element_type=jnp.float32) + b3_ref[...]
    h = jnp.maximum(h, 0.0).astype(jnp.bfloat16)

    # fc4 -> softmax over feature axis (padded logits carry a -1e30 bias -> exp == 0)
    logits = jnp.dot(h, w4_ref[...], preferred_element_type=jnp.float32) + b4_ref[...]
    m = jnp.max(logits, axis=-1, keepdims=True)
    e = jnp.exp(logits - m)
    denom = jnp.sum(e, axis=-1, keepdims=True)
    o_ref[...] = (e * pl.reciprocal(denom, approx=False)).astype(o_ref.dtype)

    # TODO(synk): training-mode Dropout(0.3) would need pltpu.prng_seed/prng_random_bits;
    # eval-mode (identity) semantics implemented here.


# ----------------------------------------------------------------------------
# Wrapper
# ----------------------------------------------------------------------------
def _pick_batch_tile(B, requested):
    if requested is not None:
        tb = requested
    elif B % 128 == 0 and B >= 256:
        tb = 128  # >= 2 grid steps -> both v7x TensorCores get work via "parallel"
    elif B % 8 == 0:
        # largest multiple-of-8 divisor of B that is <= 128
        tb = max(t for t in range(8, min(128, B) + 1, 8) if B % t == 0)
    else:
        tb = B
    assert B % tb == 0, "batch must be divisible by batch_tile"
    assert tb == B or tb % 8 == 0, "batch_tile must be a multiple of 8 (sublane) or equal B"
    return tb


def robust_portfolio_forward(x, params, *, batch_tile=None):
    """x: [B, input_size] float32; params: dict of (w1,b1,...,w4,b4) in float32."""
    B, in_dim = x.shape
    out_dim = params["w4"].shape[1]
    out_pad = ((out_dim + 127) // 128) * 128  # lane-dense output width

    tb = _pick_batch_tile(B, batch_tile)

    # bf16 MXU operands (halves weight DMA + ~2x matmul throughput); biases stay f32.
    xb = x.astype(jnp.bfloat16)
    w1 = params["w1"].astype(jnp.bfloat16); b1 = params["b1"].astype(jnp.float32)
    w2 = params["w2"].astype(jnp.bfloat16); b2 = params["b2"].astype(jnp.float32)
    w3 = params["w3"].astype(jnp.bfloat16); b3 = params["b3"].astype(jnp.float32)
    w4 = params["w4"].astype(jnp.bfloat16); b4 = params["b4"].astype(jnp.float32)
    if out_pad != out_dim:
        w4 = jnp.pad(w4, ((0, 0), (0, out_pad - out_dim)))
        b4 = jnp.pad(b4, ((0, 0), (0, out_pad - out_dim)), constant_values=-1e30)

    # Advisory cost estimate for XLA scheduling around the custom call.
    flops = 2 * B * (in_dim * 512 + 512 * 256 + 256 * 128 + 128 * out_pad)
    bytes_accessed = (
        xb.size * 2
        + (w1.size + w2.size + w3.size + w4.size) * 2
        + (b1.size + b2.size + b3.size + b4.size) * 4
        + B * out_pad * 4
    )
    cost = pl.CostEstimate(
        flops=int(flops),
        transcendentals=int(B * out_pad),
        bytes_accessed=int(bytes_accessed),
    )

    def full(arr):
        # Whole-array block, constant block index -> resident in VMEM, fetched once.
        return pl.BlockSpec(arr.shape, lambda i: (0, 0))

    out = pl.pallas_call(
        robust_portfolio_kernel,
        out_shape=jax.ShapeDtypeStruct((B, out_pad), jnp.float32),
        grid_spec=pltpu.PrefetchScalarGridSpec(
            num_scalar_prefetch=0,
            grid=(B // tb,),
            in_specs=[
                pl.BlockSpec((tb, in_dim), lambda i: (i, 0)),
                full(w1), full(b1),
                full(w2), full(b2),
                full(w3), full(b3),
                full(w4), full(b4),
            ],
            out_specs=pl.BlockSpec((tb, out_pad), lambda i: (i, 0)),
        ),
        compiler_params=pltpu.CompilerParams(
            dimension_semantics=("parallel",),
        ),
        cost_estimate=cost,
    )(xb, w1, b1, w2, b2, w3, b3, w4, b4)

    return out[:, :out_dim] if out_pad != out_dim else out


# ----------------------------------------------------------------------------
# Init + pure-JAX reference
# ----------------------------------------------------------------------------
def init_params(key, input_size, output_size):
    """PyTorch nn.Linear-style init: U[-1/sqrt(fan_in), 1/sqrt(fan_in)].
    Weights stored as [in_features, out_features]; biases as [1, out_features]."""
    dims = [(input_size, 512), (512, 256), (256, 128), (128, output_size)]
    params = {}
    for idx, (fan_in, fan_out) in enumerate(dims, start=1):
        key, kw, kb = jax.random.split(key, 3)
        bound = 1.0 / jnp.sqrt(jnp.float32(fan_in))
        params[f"w{idx}"] = jax.random.uniform(
            kw, (fan_in, fan_out), jnp.float32, minval=-bound, maxval=bound
        )
        params[f"b{idx}"] = jax.random.uniform(
            kb, (1, fan_out), jnp.float32, minval=-bound, maxval=bound
        )
    return params


def reference_forward(x, p):
    h = jnp.maximum(x @ p["w1"] + p["b1"], 0.0)
    h = jnp.maximum(h @ p["w2"] + p["b2"], 0.0)
    h = jnp.maximum(h @ p["w3"] + p["b3"], 0.0)
    logits = h @ p["w4"] + p["b4"]
    return jax.nn.softmax(logits, axis=1)


if __name__ == "__main__":
    key = jax.random.PRNGKey(0)
    input_size, output_size = 64, 16
    params = init_params(key, input_size, output_size)

    # Tolerances: bf16 MXU operands vs f32 reference -> ~1e-3..1e-2 elementwise error
    # on the probabilities; softmax normalization itself is exact f32.
    ATOL = 2e-2

    # Case 1: small batch (single grid step).
    key, kx = jax.random.split(key)
    x_small = jax.random.normal(kx, (8, input_size), jnp.float32)
    out_small = jax.block_until_ready(robust_portfolio_forward(x_small, params))
    ref_small = reference_forward(x_small, params)
    assert out_small.shape == (8, output_size)
    assert jnp.allclose(out_small, ref_small, atol=ATOL), "mismatch vs JAX reference (small)"
    assert jnp.allclose(jnp.sum(out_small, axis=1), 1.0, atol=1e-5), "rows must sum to 1 (small)"

    # Case 2: larger batch exercising the multi-step grid (tb=128, grid=2, megacore-splittable).
    key, kx = jax.random.split(key)
    x_big = jax.random.normal(kx, (256, input_size), jnp.float32)
    out_big = jax.block_until_ready(robust_portfolio_forward(x_big, params))
    ref_big = reference_forward(x_big, params)
    assert out_big.shape == (256, output_size)
    assert jnp.allclose(out_big, ref_big, atol=ATOL), "mismatch vs JAX reference (big)"
    assert jnp.allclose(jnp.sum(out_big, axis=1), 1.0, atol=1e-5), "rows must sum to 1 (big)"

    print("KERNEL_OK")
</pallas_src>

<mosaic_0001>
module attributes {stable_mosaic.version = 11 : i64} {
  func.func @robust_portfolio_kernel(%arg0: i32, %arg1: memref<8x64xbf16, #tpu.memory_space<vmem>>, %arg2: memref<64x512xbf16, #tpu.memory_space<vmem>>, %arg3: memref<1x512xf32, #tpu.memory_space<vmem>>, %arg4: memref<512x256xbf16, #tpu.memory_space<vmem>>, %arg5: memref<1x256xf32, #tpu.memory_space<vmem>>, %arg6: memref<256x128xbf16, #tpu.memory_space<vmem>>, %arg7: memref<1x128xf32, #tpu.memory_space<vmem>>, %arg8: memref<128x128xbf16, #tpu.memory_space<vmem>>, %arg9: memref<1x128xf32, #tpu.memory_space<vmem>>, %arg10: memref<8x128xf32, #tpu.memory_space<vmem>>) attributes {dimension_semantics = [#tpu.dimension_semantics<parallel>], iteration_bounds = array<i64: 1>, scalar_prefetch = 0 : i64, scratch_operands = 0 : i64, tpu.core_type = #tpu.core_type<tc>, window_params = [{transform_indices = @transform_0, window_bounds = array<i64: 8, 64>}, {pipeline_mode = #tpu.pipeline_mode<synchronous>, transform_indices = @transform_1, window_bounds = array<i64: 64, 512>}, {pipeline_mode = #tpu.pipeline_mode<synchronous>, transform_indices = @transform_2, window_bounds = array<i64: 1, 512>}, {pipeline_mode = #tpu.pipeline_mode<synchronous>, transform_indices = @transform_3, window_bounds = array<i64: 512, 256>}, {pipeline_mode = #tpu.pipeline_mode<synchronous>, transform_indices = @transform_4, window_bounds = array<i64: 1, 256>}, {pipeline_mode = #tpu.pipeline_mode<synchronous>, transform_indices = @transform_5, window_bounds = array<i64: 256, 128>}, {pipeline_mode = #tpu.pipeline_mode<synchronous>, transform_indices = @transform_6, window_bounds = array<i64: 1, 128>}, {pipeline_mode = #tpu.pipeline_mode<synchronous>, transform_indices = @transform_7, window_bounds = array<i64: 128, 128>}, {pipeline_mode = #tpu.pipeline_mode<synchronous>, transform_indices = @transform_8, window_bounds = array<i64: 1, 128>}, {transform_indices = @transform_9, window_bounds = array<i64: 8, 128>}]} {
    %c0 = arith.constant 0 : index
    %c0_0 = arith.constant 0 : index
    %0 = vector.load %arg1[%c0, %c0_0] : memref<8x64xbf16, #tpu.memory_space<vmem>>, vector<8x64xbf16>
    %c0_1 = arith.constant 0 : index
    %c0_2 = arith.constant 0 : index
    %1 = vector.load %arg2[%c0_1, %c0_2] : memref<64x512xbf16, #tpu.memory_space<vmem>>, vector<64x512xbf16>
    %cst = arith.constant dense<0.000000e+00> : vector<8x512xf32>
    %2 = tpu.matmul %0, %1, %cst {dimension_numbers = #tpu.dot_dimension_numbers<[1], [0], [0], [1], [0, 0, 1, 1], [], []>} : vector<8x64xbf16>, vector<64x512xbf16>, vector<8x512xf32> -> vector<8x512xf32>
    %c0_3 = arith.constant 0 : index
    %c0_4 = arith.constant 0 : index
    %3 = vector.load %arg3[%c0_3, %c0_4] : memref<1x512xf32, #tpu.memory_space<vmem>>, vector<1x512xf32>
    %4 = vector.broadcast %3 : vector<1x512xf32> to vector<8x512xf32>
    %5 = arith.addf %2, %4 : vector<8x512xf32>
    %cst_5 = arith.constant 0.000000e+00 : f32
    %6 = vector.broadcast %cst_5 : f32 to vector<8x512xf32>
    %7 = arith.maximumf %5, %6 : vector<8x512xf32>
    %8 = arith.truncf %7 : vector<8x512xf32> to vector<8x512xbf16>
    %c0_6 = arith.constant 0 : index
    %c0_7 = arith.constant 0 : index
    %9 = vector.load %arg4[%c0_6, %c0_7] : memref<512x256xbf16, #tpu.memory_space<vmem>>, vector<512x256xbf16>
    %cst_8 = arith.constant dense<0.000000e+00> : vector<8x256xf32>
    %10 = tpu.matmul %8, %9, %cst_8 {dimension_numbers = #tpu.dot_dimension_numbers<[1], [0], [0], [1], [0, 0, 1, 1], [], []>} : vector<8x512xbf16>, vector<512x256xbf16>, vector<8x256xf32> -> vector<8x256xf32>
    %c0_9 = arith.constant 0 : index
    %c0_10 = arith.constant 0 : index
    %11 = vector.load %arg5[%c0_9, %c0_10] : memref<1x256xf32, #tpu.memory_space<vmem>>, vector<1x256xf32>
    %12 = vector.broadcast %11 : vector<1x256xf32> to vector<8x256xf32>
    %13 = arith.addf %10, %12 : vector<8x256xf32>
    %cst_11 = arith.constant 0.000000e+00 : f32
    %14 = vector.broadcast %cst_11 : f32 to vector<8x256xf32>
    %15 = arith.maximumf %13, %14 : vector<8x256xf32>
    %16 = arith.truncf %15 : vector<8x256xf32> to vector<8x256xbf16>
    %c0_12 = arith.constant 0 : index
    %c0_13 = arith.constant 0 : index
    %17 = vector.load %arg6[%c0_12, %c0_13] : memref<256x128xbf16, #tpu.memory_space<vmem>>, vector<256x128xbf16>
    %cst_14 = arith.constant dense<0.000000e+00> : vector<8x128xf32>
    %18 = tpu.matmul %16, %17, %cst_14 {dimension_numbers = #tpu.dot_dimension_numbers<[1], [0], [0], [1], [0, 0, 1, 1], [], []>} : vector<8x256xbf16>, vector<256x128xbf16>, vector<8x128xf32> -> vector<8x128xf32>
    %c0_15 = arith.constant 0 : index
    %c0_16 = arith.constant 0 : index
    %19 = vector.load %arg7[%c0_15, %c0_16] : memref<1x128xf32, #tpu.memory_space<vmem>>, vector<1x128xf32>
    %20 = vector.broadcast %19 : vector<1x128xf32> to vector<8x128xf32>
    %21 = arith.addf %18, %20 : vector<8x128xf32>
    %cst_17 = arith.constant 0.000000e+00 : f32
    %22 = vector.broadcast %cst_17 : f32 to vector<8x128xf32>
    %23 = arith.maximumf %21, %22 : vector<8x128xf32>
    %24 = arith.truncf %23 : vector<8x128xf32> to vector<8x128xbf16>
    %c0_18 = arith.constant 0 : index
    %c0_19 = arith.constant 0 : index
    %25 = vector.load %arg8[%c0_18, %c0_19] : memref<128x128xbf16, #tpu.memory_space<vmem>>, vector<128x128xbf16>
    %cst_20 = arith.constant dense<0.000000e+00> : vector<8x128xf32>
    %26 = tpu.matmul %24, %25, %cst_20 {dimension_numbers = #tpu.dot_dimension_numbers<[1], [0], [0], [1], [0, 0, 1, 1], [], []>} : vector<8x128xbf16>, vector<128x128xbf16>, vector<8x128xf32> -> vector<8x128xf32>
    %c0_21 = arith.constant 0 : index
    %c0_22 = arith.constant 0 : index
    %27 = vector.load %arg9[%c0_21, %c0_22] : memref<1x128xf32, #tpu.memory_space<vmem>>, vector<1x128xf32>
    %28 = vector.broadcast %27 : vector<1x128xf32> to vector<8x128xf32>
    %29 = arith.addf %26, %28 : vector<8x128xf32>
    %cst_23 = arith.constant dense<0xFF800000> : vector<8xf32>
    %30 = vector.multi_reduction <maximumf>, %29, %cst_23 [1] : vector<8x128xf32> to vector<8xf32>
    %31 = vector.shape_cast %30 : vector<8xf32> to vector<8x1xf32>
    %32 = vector.broadcast %31 : vector<8x1xf32> to vector<8x128xf32>
    %33 = arith.subf %29, %32 : vector<8x128xf32>
    %34 = math.exp %33 : vector<8x128xf32>
    %cst_24 = arith.constant dense<0.000000e+00> : vector<8xf32>
    %35 = vector.multi_reduction <add>, %34, %cst_24 [1] : vector<8x128xf32> to vector<8xf32>
    %36 = vector.shape_cast %35 : vector<8xf32> to vector<8x1xf32>
    %37 = tpu.reciprocal %36 : vector<8x1xf32> -> vector<8x1xf32>
    %38 = vector.broadcast %37 : vector<8x1xf32> to vector<8x128xf32>
    %39 = arith.mulf %34, %38 : vector<8x128xf32>
    %c0_25 = arith.constant 0 : index
    %c0_26 = arith.constant 0 : index
    %40 = vector.load %arg10[%c0_25, %c0_26] : memref<8x128xf32, #tpu.memory_space<vmem>>, vector<8x128xf32>
    tpu.vector_store %arg10[%c0_25, %c0_26], %39 {strides = array<i32>} : memref<8x128xf32, #tpu.memory_space<vmem>>, vector<8x128xf32>,
    return
  }
  func.func @transform_0(%arg0: i32) -> (i32, i32) {
    %c0_i32 = arith.constant 0 : i32
    %c0_i32_0 = arith.constant 0 : i32
    return %arg0, %c0_i32 : i32, i32
  }
  func.func @transform_1(%arg0: i32) -> (i32, i32) {
    %c0_i32 = arith.constant 0 : i32
    %c0_i32_0 = arith.constant 0 : i32
    %c0_i32_1 = arith.constant 0 : i32
    return %c0_i32, %c0_i32_0 : i32, i32
  }
  func.func @transform_2(%arg0: i32) -> (i32, i32) {
    %c0_i32 = arith.constant 0 : i32
    %c0_i32_0 = arith.constant 0 : i32
    %c0_i32_1 = arith.constant 0 : i32
    return %c0_i32, %c0_i32_0 : i32, i32
  }
  func.func @transform_3(%arg0: i32) -> (i32, i32) {
    %c0_i32 = arith.constant 0 : i32
    %c0_i32_0 = arith.constant 0 : i32
    %c0_i32_1 = arith.constant 0 : i32
    return %c0_i32, %c0_i32_0 : i32, i32
  }
  func.func @transform_4(%arg0: i32) -> (i32, i32) {
    %c0_i32 = arith.constant 0 : i32
    %c0_i32_0 = arith.constant 0 : i32
    %c0_i32_1 = arith.constant 0 : i32
    return %c0_i32, %c0_i32_0 : i32, i32
  }
  func.func @transform_5(%arg0: i32) -> (i32, i32) {
    %c0_i32 = arith.constant 0 : i32
    %c0_i32_0 = arith.constant 0 : i32
    %c0_i32_1 = arith.constant 0 : i32
    return %c0_i32, %c0_i32_0 : i32, i32
  }
  func.func @transform_6(%arg0: i32) -> (i32, i32) {
    %c0_i32 = arith.constant 0 : i32
    %c0_i32_0 = arith.constant 0 : i32
    %c0_i32_1 = arith.constant 0 : i32
    return %c0_i32, %c0_i32_0 : i32, i32
  }
  func.func @transform_7(%arg0: i32) -> (i32, i32) {
    %c0_i32 = arith.constant 0 : i32
    %c0_i32_0 = arith.constant 0 : i32
    %c0_i32_1 = arith.constant 0 : i32
    return %c0_i32, %c0_i32_0 : i32, i32
  }
  func.func @transform_8(%arg0: i32) -> (i32, i32) {
    %c0_i32 = arith.constant 0 : i32
    %c0_i32_0 = arith.constant 0 : i32
    %c0_i32_1 = arith.constant 0 : i32
    return %c0_i32, %c0_i32_0 : i32, i32
  }
  func.func @transform_9(%arg0: i32) -> (i32, i32) {
    %c0_i32 = arith.constant 0 : i32
    %c0_i32_0 = arith.constant 0 : i32
    return %arg0, %c0_i32 : i32, i32
  }
}

</mosaic_0001>

<bundles_post_ra>
// kernel: tpu_custom_call.1
= control target key start
LH: loop header
LB: loop body
LE: loop exit
PB: predicated region body
PF: predicated region fallthrough
CT: control target
= control target key end

     0   :  { %14 = vsyncpa [#allocation3], 0  ;;  %s1901_s0 = inlined_call_operand.hbm [shape: bf16[8,64], index: 0, kind: input, shape index: {}]   ;;  %s1902_s1 = inlined_call_operand.hbm [shape: bf16[64,512], index: 1, kind: input, shape index: {}]   ;;  %s1903_s2 = inlined_call_operand.hbm [shape: f32[1,512], index: 2, kind: input, shape index: {}]   ;;  %s1904_s3 = inlined_call_operand.hbm [shape: bf16[512,256], index: 3, kind: input, shape index: {}]   ;;  %s1905_s4 = inlined_call_operand.vmem [shape: f32[1,256], index: 4, kind: input, shape index: {}]   ;;  %s1906_s5 = inlined_call_operand.hbm [shape: bf16[256,128], index: 5, kind: input, shape index: {}]   ;;  %s1907_s6 = inlined_call_operand.vmem [shape: f32[1,128], index: 6, kind: input, shape index: {}]   ;;  %s1908_s7 = inlined_call_operand.hbm [shape: bf16[128,128], index: 7, kind: input, shape index: {}]   ;;  %s1909_s8 = inlined_call_operand.vmem [shape: f32[1,128], index: 8, kind: input, shape index: {}]   ;;  %s1910_s9 = inlined_call_operand.hbm [shape: f32[8,128], index: 9, kind: output, shape index: {}]  }
   0x1   :  { %15 = vsyncpa [#allocation6], 0 }
   0x2   :  { %16 = vsyncpa [#allocation9], 0 }
   0x3   :  { %17 = vsyncpa [#allocation12], 0  ;;  %s34_s11 = sshll.u32 %s1902_s1, 4  ;;  %s35_s11 = int_to_ptr.hbm [resolvable:$true] %s34_s11 }
   0x4   :  { %18 = vsyncpa [#allocation4], 0  ;;  %s1798_s12 = smov [#allocation5]   ;;  %s58_s16 = sshll.u32 %s1904_s3, 4  ;;  %s59_s16 = int_to_ptr.hbm [resolvable:$true] %s58_s16 }
   0x5   :  { %s36_s13 = sshll.u32 %s1798_s12, 4  ;;  %s1799_s17 = smov 256   ;;  %s37_s13 = int_to_ptr.vmem [resolvable:$true] %s36_s13 }
   0x6   :  { %s1800_s18 = smov 16   ;;  %s1801_s19 = smov [#allocation8]  }
   0x7   :  { %42 = dma.hbm_to_vmem [thread:$0]  %s35_s11, 2048, %s37_s13, [#allocation6], %s1799_s17, %s1799_s17, %s1800_s18  }
   0x8   :  { %s60_s20 = sshll.u32 %s1801_s19, 4  ;;  %s1802_s21 = smov 128   ;;  %s61_s20 = int_to_ptr.vmem [resolvable:$true] %s60_s20 }
   0x9   :  { %s1803_s22 = smov 8   ;;  %s24_s24 = sshll.u32 %s1901_s0, 4  ;;  %s25_s24 = int_to_ptr.hbm [resolvable:$true] %s24_s24 }
   0xa   :  { %66 = dma.hbm_to_vmem [thread:$0]  %s59_s16, 8192, %s61_s20, [#allocation9], %s1802_s21, %s1802_s21, %s1803_s22  }
   0xb   :  { %s1804_s25 = smov [#allocation2]   ;;  %s48_s28 = sshll.u32 %s1903_s2, 4  ;;  %s49_s28 = int_to_ptr.hbm [resolvable:$true] %s48_s28 }
   0xc   :  { %s26_s26 = sshll.u32 %s1804_s25, 4  ;;  %s1805_s29 = smov [#allocation7]   ;;  %s27_s26 = int_to_ptr.vmem [resolvable:$true] %s26_s26 }
   0xd   :  { %29 = dma.hbm_to_vmem [thread:$0]  %s25_s24, 64, %s27_s26, [#allocation3]  }
   0xe   :  { %s50_s30 = sshll.u32 %s1805_s29, 4  ;;  %s73_s12 = sshll.u32 %s1906_s5, 4  ;;  %s51_s30 = int_to_ptr.vmem [resolvable:$true] %s50_s30  ;;  %s74_s12 = int_to_ptr.hbm [resolvable:$true] %s73_s12 }
   0xf   :  { %53 = dma.hbm_to_vmem [thread:$0]  %s49_s28, 64, %s51_s30, [#allocation6]  }
  0x10   :  { %s1806_s0 = smov [#allocation10]   ;;  %s88_s16 = sshll.u32 %s1908_s7, 4  ;;  %s89_s16 = int_to_ptr.hbm [resolvable:$true] %s88_s16 }
  0x11   :  { %s75_s13 = sshll.u32 %s1806_s0, 4  ;;  %s1807_s17 = smov 64   ;;  %s76_s13 = int_to_ptr.vmem [resolvable:$true] %s75_s13 }
  0x12   :  { %s1808_s2 = smov 4   ;;  %s1809_s18 = smov [#allocation11]  }
  0x13   :  { %81 = dma.hbm_to_vmem [thread:$0]  %s74_s12, 2048, %s76_s13, [#allocation9], %s1807_s17, %s1807_s17, %s1808_s2  }
  0x14   :  { %s90_s19 = sshll.u32 %s1809_s18, 4  ;;  %s91_s19 = int_to_ptr.vmem [resolvable:$true] %s90_s19 }
  0x15   :  { %96 = dma.hbm_to_vmem [thread:$0]  %s89_s16, 1024, %s91_s19, [#allocation12], %s1807_s17, %s1807_s17, %s1808_s2  }
  0x16   :  { %1788 = dma.done.wait [#allocation3], 64  }
  0x17   :  { %1789 = vsyncadd [#allocation3], 4294967232 }
  0x18   :  { %1790 = dma.done.wait [#allocation6], 2112  }
  0x19   :  { %1791 = vsyncadd [#allocation6], 4294965184 }
  0x1a   :  { %1792 = dma.done.wait [#allocation9], 10240  }
  0x1b   :  { %1793 = vsyncadd [#allocation9], 4294957056 }
  0x1c   :  { %1794 = dma.done.wait [#allocation12], 1024  }
  0x1d   :  { %1795 = vsyncadd [#allocation12], 4294966272  ;;  %v1127_v0 = vld [vmem:[#allocation5 + $0x60] sm:$0xf]  ;;  %v1511_v1 = vld [vmem:[#allocation5 + $0x6c] sm:$0xf0] }
  0x1e   :  { %v1509_v2 = vld [vmem:[#allocation5 + $0x64] sm:$0xf]  ;;  %v1128_v3 = vor.u32 %v1511_v1, %v1127_v0  ;;  %v1129_v4 = vld [vmem:[#allocation5 + $0x70] sm:$0xf0]  ;;  %v1135_v5 = vld [vmem:[#allocation5 + $0x68] sm:$0xf] }
  0x1f   :  { %v1512_v6 = vld [vmem:[#allocation5 + $0x74] sm:$0xf0]  ;;  %v1132_v7 = vor.u32 %v1509_v2, %v1129_v4  ;;  %v1111_v9 = vld [vmem:[#allocation5 + $0x40] sm:$0xf]  ;;  %v1507_v10 = vld [vmem:[#allocation5 + $0x4c] sm:$0xf0] }
  0x20   :  { %v1136_v8 = vor.u32 %v1512_v6, %v1135_v5  ;;  %v1505_v11 = vld [vmem:[#allocation5 + $0x44] sm:$0xf]  ;;  %239 = vmatpush.bf16.msra.mxu3 %v1128_v3  ;;  %v1112_v12 = vor.u32 %v1507_v10, %v1111_v9  ;;  %v1113_v13 = vld [vmem:[#allocation5 + $0x50] sm:$0xf0]  ;;  %v1119_v14 = vld [vmem:[#allocation5 + $0x48] sm:$0xf] }
  0x21   :  { %v1508_v15 = vld [vmem:[#allocation5 + $0x54] sm:$0xf0]  ;;  %252 = vmatpush.bf16.msra.mxu1 %v1132_v7  ;;  %v1116_v16 = vor.u32 %v1505_v11, %v1113_v13  ;;  %v1095_v18 = vld [vmem:[#allocation5 + $0x20] sm:$0xf]  ;;  %v1503_v19 = vld [vmem:[#allocation5 + $0x2c] sm:$0xf0] }
  0x22   :  { %265 = vmatpush.bf16.msra.mxu2 %v1136_v8  ;;  %v1120_v17 = vor.u32 %v1508_v15, %v1119_v14  ;;  %v1501_v20 = vld [vmem:[#allocation5 + $0x24] sm:$0xf]  ;;  %v1097_v21 = vld [vmem:[#allocation5 + $0x30] sm:$0xf0]  ;;  %v1103_v22 = vld [vmem:[#allocation5 + $0x28] sm:$0xf]  ;;  %v1096_v24 = vor.u32 %v1503_v19, %v1095_v18 }
  0x23   :  { %v1504_v23 = vld [vmem:[#allocation5 + $0x34] sm:$0xf0]  ;;  %v1100_v25 = vor.u32 %v1501_v20, %v1097_v21  ;;  %v1079_v27 = vld [vmem:[#allocation5] sm:$0xf]  ;;  %v1499_v28 = vld [vmem:[#allocation5 + $0xc] sm:$0xf0] }
  0x24   :  { %240 = vmatpush.bf16.msra.mxu3 %v1112_v12  ;;  %v1104_v26 = vor.u32 %v1504_v23, %v1103_v22  ;;  %v1497_v29 = vld [vmem:[#allocation5 + $0x4] sm:$0xf]  ;;  %v1081_v30 = vld [vmem:[#allocation5 + $0x10] sm:$0xf0]  ;;  %v1087_v31 = vld [vmem:[#allocation5 + $0x8] sm:$0xf]  ;;  %v1080_v35 = vor.u32 %v1499_v28, %v1079_v27 }
  0x25   :  { %253 = vmatpush.bf16.msra.mxu1 %v1116_v16  ;;  %v1500_v32 = vld [vmem:[#allocation5 + $0x14] sm:$0xf0]  ;;  %v1510_v33 = vld [vmem:[#allocation5 + $0x6c] sm:$0xf]  ;;  %v1137_v34 = vld [vmem:[#allocation5 + $0x78] sm:$0xf0]  ;;  %v1084_v38 = vor.u32 %v1497_v29, %v1081_v30 }
  0x26   :  { %266 = vmatpush.bf16.msra.mxu2 %v1120_v17  ;;  %vm231_vm0 = vcmask 523264   ;;  %v1267_v36 = vld [vmem:[#allocation8 + $0xf0] sm:$0xf]  ;;  %v1544_v37 = vld [vmem:[#allocation8 + $0xf4] sm:$0xf0]  ;;  %v1088_v39 = vor.u32 %v1500_v32, %v1087_v31  ;;  %v1140_v44 = vor.u32 %v1510_v33, %v1137_v34  ;;  %s1064_s24 = sshll.u32 %s1910_s9, 4  ;;  %s1065_s24 = int_to_ptr.hbm [resolvable:$true] %s1064_s24 }
  0x27   :  { %v1506_v40 = vld [vmem:[#allocation5 + $0x4c] sm:$0xf]  ;;  %v1121_v41 = vld [vmem:[#allocation5 + $0x58] sm:$0xf0]  ;;  %v1203_v42 = vld [vmem:[#allocation8 + $0x70] sm:$0xf]  ;;  %v1268_v45 = vor.u32 %v1544_v37, %v1267_v36 }
  0x28   :  { %241 = vmatpush.bf16.msra.mxu3 %v1096_v24  ;;  %v1528_v43 = vld [vmem:[#allocation8 + $0x74] sm:$0xf0]  ;;  %v1259_v46 = vld [vmem:[#allocation8 + $0xe0] sm:$0xf]  ;;  %v1331_v48 = vld [vmem:[#allocation8 + $0x170] sm:$0xf]  ;;  %v1124_v58 = vor.u32 %v1506_v40, %v1121_v41 }
  0x29   :  { %254 = vmatpush.bf16.msra.mxu1 %v1100_v25  ;;  %v1204_v47 = vor.u32 %v1528_v43, %v1203_v42  ;;  %v1560_v49 = vld [vmem:[#allocation8 + $0x174] sm:$0xf0]  ;;  %v1542_v50 = vld [vmem:[#allocation8 + $0xe4] sm:$0xf0]  ;;  %v1195_v52 = vld [vmem:[#allocation8 + $0x60] sm:$0xf] }
  0x2a   :  { %267 = vmatpush.bf16.msra.mxu2 %v1104_v26  ;;  %v1332_v51 = vor.u32 %v1560_v49, %v1331_v48  ;;  %v1526_v53 = vld [vmem:[#allocation8 + $0x64] sm:$0xf0]  ;;  %v1879_v54 = vld [vmem:[#allocation2] sm:$0xf]  ;;  %v1323_v55 = vld [vmem:[#allocation8 + $0x160] sm:$0xf]  ;;  %v1260_v60 = vor.u32 %v1542_v50, %v1259_v46 }
  0x2b   :  { %685 = vmatpush.bf16.msra.mxu0 %v1204_v47  ;;  %v1558_v56 = vld [vmem:[#allocation8 + $0x164] sm:$0xf0]  ;;  %v1196_v57 = vor.u32 %v1526_v53, %v1195_v52  ;;  %v1187_v61 = vld [vmem:[#allocation8 + $0x50] sm:$0xf]  ;;  %v1524_v62 = vld [vmem:[#allocation8 + $0x54] sm:$0xf0] }
  0x2c   :  { %242 = vmatpush.bf16.msra.mxu3 %v1080_v35  ;;  %v1502_v59 = vld [vmem:[#allocation5 + $0x2c] sm:$0xf]  ;;  %v1105_v63 = vld [vmem:[#allocation5 + $0x38] sm:$0xf0]  ;;  %v1251_v0 = vld [vmem:[#allocation8 + $0xd0] sm:$0xf]  ;;  %v1324_v2 = vor.u32 %v1558_v56, %v1323_v55  ;;  %v1188_v6 = vor.u32 %v1524_v62, %v1187_v61 }
  0x2d   :  { %255 = vmatpush.bf16.msra.mxu1 %v1084_v38  ;;  %v1540_v1 = vld [vmem:[#allocation8 + $0xd4] sm:$0xf0]  ;;  %v1315_v3 = vld [vmem:[#allocation8 + $0x150] sm:$0xf]  ;;  %v1498_v5 = vld [vmem:[#allocation5 + $0xc] sm:$0xf]  ;;  %v1108_v7 = vor.u32 %v1502_v59, %v1105_v63 }
  0x2e   :  { %268 = vmatpush.bf16.msra.mxu2 %v1088_v39  ;;  %v1556_v4 = vld [vmem:[#allocation8 + $0x154] sm:$0xf0]  ;;  %v1252_v9 = vor.u32 %v1540_v1, %v1251_v0  ;;  %v1179_v10 = vld [vmem:[#allocation8 + $0x40] sm:$0xf]  ;;  %v1522_v11 = vld [vmem:[#allocation8 + $0x44] sm:$0xf0] }
  0x2f   :  { %1141 = vmatmul.msk.bf16.vlgmr.msra.gmra.mxu3 %vm231_vm0, %v1879_v54  ;;  %686 = vmatpush.bf16.msra.mxu0 %v1196_v57  ;;  %v1089_v8 = vld [vmem:[#allocation5 + $0x18] sm:$0xf0]  ;;  %v1243_v12 = vld [vmem:[#allocation8 + $0xc0] sm:$0xf]  ;;  %v1538_v13 = vld [vmem:[#allocation8 + $0xc4] sm:$0xf0]  ;;  %v1316_v14 = vor.u32 %v1556_v4, %v1315_v3  ;;  %v1180_v19 = vor.u32 %v1522_v11, %v1179_v10 }
  0x30   :  { %278 = vmatpush.bf16.msrb.mxu3 %v1140_v44  ;;  %1142 = vmatmul.msk.bf16.vlgmr.msra.gmra.mxu1 %vm231_vm0, %v1879_v54  ;;  %v1307_v15 = vld [vmem:[#allocation8 + $0x140] sm:$0xf]  ;;  %v1554_v16 = vld [vmem:[#allocation8 + $0x144] sm:$0xf0]  ;;  %v1395_v17 = vld [vmem:[#allocation8 + $0x1f0] sm:$0xf]  ;;  %v1092_v20 = vor.u32 %v1498_v5, %v1089_v8  ;;  %v1244_v21 = vor.u32 %v1538_v13, %v1243_v12 }
  0x31   :  { %698 = vmatpush.bf16.msrb.mxu1 %v1268_v45  ;;  %1143 = vmatmul.msk.bf16.vlgmr.msra.gmra.mxu2 %vm231_vm0, %v1879_v54  ;;  %v1576_v18 = vld [vmem:[#allocation8 + $0x1f4] sm:$0xf0]  ;;  %v1171_v22 = vld [vmem:[#allocation8 + $0x30] sm:$0xf]  ;;  %v1308_v26 = vor.u32 %v1554_v16, %v1307_v15  ;;  %v1387_v31 = vld [vmem:[#allocation8 + $0x1e0] sm:$0xf] }
  0x32   :  { %711 = vmatpush.bf16.msrb.mxu2 %v1332_v51  ;;  %v1520_v23 = vld [vmem:[#allocation8 + $0x34] sm:$0xf0]  ;;  %v1235_v24 = vld [vmem:[#allocation8 + $0xb0] sm:$0xf]  ;;  %v1396_v27 = vor.u32 %v1576_v18, %v1395_v17  ;;  %v1574_v32 = vld [vmem:[#allocation8 + $0x1e4] sm:$0xf0] }
  0x33   :  { %687 = vmatpush.bf16.msra.mxu0 %v1188_v6  ;;  %v1536_v25 = vld [vmem:[#allocation8 + $0xb4] sm:$0xf0]  ;;  %v1299_v28 = vld [vmem:[#allocation8 + $0x130] sm:$0xf]  ;;  %v1172_v30 = vor.u32 %v1520_v23, %v1171_v22  ;;  %v1163_v34 = vld [vmem:[#allocation8 + $0x20] sm:$0xf]  ;;  %v1388_v41 = vor.u32 %v1574_v32, %v1387_v31 }
  0x34   :  { %279 = vmatpush.bf16.msrb.mxu3 %v1124_v58  ;;  %v1552_v29 = vld [vmem:[#allocation8 + $0x134] sm:$0xf0]  ;;  %v1236_v33 = vor.u32 %v1536_v25, %v1235_v24  ;;  %v1518_v35 = vld [vmem:[#allocation8 + $0x24] sm:$0xf0]  ;;  %v1227_v36 = vld [vmem:[#allocation8 + $0xa0] sm:$0xf] }
  0x35   :  { %699 = vmatpush.bf16.msrb.mxu1 %v1260_v60  ;;  %v1534_v37 = vld [vmem:[#allocation8 + $0xa4] sm:$0xf0]  ;;  %v1300_v38 = vor.u32 %v1552_v29, %v1299_v28  ;;  %v1291_v39 = vld [vmem:[#allocation8 + $0x120] sm:$0xf]  ;;  %v1164_v42 = vor.u32 %v1518_v35, %v1163_v34  ;;  %v1379_v43 = vld [vmem:[#allocation8 + $0x1d0] sm:$0xf] }
  0x36   :  { %712 = vmatpush.bf16.msrb.mxu2 %v1324_v2  ;;  %v1550_v40 = vld [vmem:[#allocation8 + $0x124] sm:$0xf0]  ;;  %v1572_v44 = vld [vmem:[#allocation8 + $0x1d4] sm:$0xf0]  ;;  %v1228_v45 = vor.u32 %v1534_v37, %v1227_v36  ;;  %v1155_v46 = vld [vmem:[#allocation8 + $0x10] sm:$0xf] }
  0x37   :  { %688 = vmatpush.bf16.msra.mxu0 %v1180_v19  ;;  %v1516_v47 = vld [vmem:[#allocation8 + $0x14] sm:$0xf0]  ;;  %v1219_v48 = vld [vmem:[#allocation8 + $0x90] sm:$0xf]  ;;  %v1292_v50 = vor.u32 %v1550_v40, %v1291_v39  ;;  %v1380_v53 = vor.u32 %v1572_v44, %v1379_v43  ;;  %v1211_v55 = vld [vmem:[#allocation8 + $0x80] sm:$0xf] }
  0x38   :  { %280 = vmatpush.bf16.msrb.mxu3 %v1108_v7  ;;  %v1532_v49 = vld [vmem:[#allocation8 + $0x94] sm:$0xf0]  ;;  %v1283_v51 = vld [vmem:[#allocation8 + $0x110] sm:$0xf]  ;;  %v1156_v56 = vor.u32 %v1516_v47, %v1155_v46  ;;  %v1371_v57 = vld [vmem:[#allocation8 + $0x1c0] sm:$0xf] }
  0x39   :  { %700 = vmatpush.bf16.msrb.mxu1 %v1252_v9  ;;  %v1548_v52 = vld [vmem:[#allocation8 + $0x114] sm:$0xf0]  ;;  %v1570_v58 = vld [vmem:[#allocation8 + $0x1c4] sm:$0xf0]  ;;  %v1220_v59 = vor.u32 %v1532_v49, %v1219_v48  ;;  %v1147_v61 = vld [vmem:[#allocation8] sm:$0xf] }
  0x3a   :  { %713 = vmatpush.bf16.msrb.mxu2 %v1316_v14  ;;  %v1530_v60 = vld [vmem:[#allocation8 + $0x84] sm:$0xf0]  ;;  %v1284_v63 = vor.u32 %v1548_v52, %v1283_v51  ;;  %v1527_v0 = vld [vmem:[#allocation8 + $0x74] sm:$0xf]  ;;  %v1205_v1 = vld [vmem:[#allocation8 + $0x78] sm:$0xf0]  ;;  %v1372_v5 = vor.u32 %v1570_v58, %v1371_v57 }
  0x3b   :  { %689 = vmatpush.bf16.msra.mxu0 %v1172_v30  ;;  %v1514_v62 = vld [vmem:[#allocation8 + $0x4] sm:$0xf0]  ;;  %v1269_v2 = vld [vmem:[#allocation8 + $0xf8] sm:$0xf0]  ;;  %v1275_v3 = vld [vmem:[#allocation8 + $0x100] sm:$0xf]  ;;  %v1212_v9 = vor.u32 %v1530_v60, %v1211_v55  ;;  %v1208_v10 = vor.u32 %v1527_v0, %v1205_v1 }
  0x3c   :  { %281 = vmatpush.bf16.msrb.mxu3 %v1092_v20  ;;  %v1546_v4 = vld [vmem:[#allocation8 + $0x104] sm:$0xf0]  ;;  %v1148_v6 = vor.u32 %v1514_v62, %v1147_v61  ;;  %v1559_v7 = vld [vmem:[#allocation8 + $0x174] sm:$0xf]  ;;  %v1333_v8 = vld [vmem:[#allocation8 + $0x178] sm:$0xf0] }
  0x3d   :  { %701 = vmatpush.bf16.msrb.mxu1 %v1244_v21  ;;  %v1276_v12 = vor.u32 %v1546_v4, %v1275_v3  ;;  %v1541_v13 = vld [vmem:[#allocation8 + $0xe4] sm:$0xf]  ;;  %v1261_v14 = vld [vmem:[#allocation8 + $0xe8] sm:$0xf0]  ;;  %v1336_v15 = vor.u32 %v1559_v7, %v1333_v8  ;;  %v1539_v17 = vld [vmem:[#allocation8 + $0xd4] sm:$0xf] }
  0x3e   :  { %714 = vmatpush.bf16.msrb.mxu2 %v1308_v26  ;;  %v1264_v16 = vor.u32 %v1541_v13, %v1261_v14  ;;  %v1253_v18 = vld [vmem:[#allocation8 + $0xd8] sm:$0xf0]  ;;  %v1363_v20 = vld [vmem:[#allocation8 + $0x1b0] sm:$0xf]  ;;  %v1568_v21 = vld [vmem:[#allocation8 + $0x1b4] sm:$0xf0] }
  0x3f   :  { %1144 = vmatmul.msk.bf16.vlgmr.msrb.gmra.mxu3 %vm231_vm0, %v1879_v54  ;;  %690 = vmatpush.bf16.msra.mxu0 %v1164_v42  ;;  %v1543_v54 = vld [vmem:[#allocation8 + $0xf4] sm:$0xf]  ;;  %v1256_v19 = vor.u32 %v1539_v17, %v1253_v18  ;;  %v1364_v22 = vor.u32 %v1568_v21, %v1363_v20  ;;  %v1525_v23 = vld [vmem:[#allocation8 + $0x64] sm:$0xf]  ;;  %v1197_v24 = vld [vmem:[#allocation8 + $0x68] sm:$0xf0] }
  0x40   :  { %724 = vmatpush.bf16.msra.mxu3 %v1396_v27  ;;  %v1272_v11 = vor.u32 %v1543_v54, %v1269_v2  ;;  %v1557_v25 = vld [vmem:[#allocation8 + $0x164] sm:$0xf]  ;;  %v1200_v26 = vor.u32 %v1525_v23, %v1197_v24  ;;  %v1325_v27 = vld [vmem:[#allocation8 + $0x168] sm:$0xf0]  ;;  %v1355_v32 = vld [vmem:[#allocation8 + $0x1a0] sm:$0xf] }
  0x41   :  { %702 = vmatpush.bf16.msrb.mxu1 %v1236_v33  ;;  %v1328_v28 = vor.u32 %v1557_v25, %v1325_v27  ;;  %v1537_v29 = vld [vmem:[#allocation8 + $0xc4] sm:$0xf]  ;;  %v1245_v30 = vld [vmem:[#allocation8 + $0xc8] sm:$0xf0]  ;;  %v1566_v33 = vld [vmem:[#allocation8 + $0x1a4] sm:$0xf0] }
  0x42   :  { %715 = vmatpush.bf16.msrb.mxu2 %v1300_v38  ;;  %v1248_v31 = vor.u32 %v1537_v29, %v1245_v30  ;;  %v1356_v34 = vor.u32 %v1566_v33, %v1355_v32  ;;  %v1523_v35 = vld [vmem:[#allocation8 + $0x54] sm:$0xf]  ;;  %v1189_v36 = vld [vmem:[#allocation8 + $0x58] sm:$0xf0]  ;;  %v1347_v44 = vld [vmem:[#allocation8 + $0x190] sm:$0xf] }
  0x43   :  { %691 = vmatpush.bf16.msra.mxu0 %v1156_v56  ;;  %v1555_v37 = vld [vmem:[#allocation8 + $0x154] sm:$0xf]  ;;  %v1192_v38 = vor.u32 %v1523_v35, %v1189_v36  ;;  %v1317_v39 = vld [vmem:[#allocation8 + $0x158] sm:$0xf0]  ;;  %v1521_v47 = vld [vmem:[#allocation8 + $0x44] sm:$0xf] }
  0x44   :  { %725 = vmatpush.bf16.msra.mxu3 %v1388_v41  ;;  %v1320_v40 = vor.u32 %v1555_v37, %v1317_v39  ;;  %v1535_v41 = vld [vmem:[#allocation8 + $0xb4] sm:$0xf]  ;;  %v1237_v42 = vld [vmem:[#allocation8 + $0xb8] sm:$0xf0]  ;;  %v1181_v48 = vld [vmem:[#allocation8 + $0x48] sm:$0xf0] }
  0x45   :  { %703 = vmatpush.bf16.msrb.mxu1 %v1228_v45  ;;  %v1240_v43 = vor.u32 %v1535_v41, %v1237_v42  ;;  %v1564_v45 = vld [vmem:[#allocation8 + $0x194] sm:$0xf0]  ;;  %v1553_v49 = vld [vmem:[#allocation8 + $0x144] sm:$0xf]  ;;  %v1309_v51 = vld [vmem:[#allocation8 + $0x148] sm:$0xf0] }
  0x46   :  { %716 = vmatpush.bf16.msrb.mxu2 %v1292_v50  ;;  %v1348_v46 = vor.u32 %v1564_v45, %v1347_v44  ;;  %v1184_v50 = vor.u32 %v1521_v47, %v1181_v48  ;;  %v1312_v52 = vor.u32 %v1553_v49, %v1309_v51  ;;  %v1229_v55 = vld [vmem:[#allocation8 + $0xa8] sm:$0xf0]  ;;  %v1339_v57 = vld [vmem:[#allocation8 + $0x180] sm:$0xf]  ;;  %v1562_v58 = vld [vmem:[#allocation8 + $0x184] sm:$0xf0] }
  0x47   :  { %692 = vmatpush.bf16.msra.mxu0 %v1148_v6  ;;  %v1519_v60 = vld [vmem:[#allocation8 + $0x34] sm:$0xf]  ;;  %v1173_v61 = vld [vmem:[#allocation8 + $0x38] sm:$0xf0]  ;;  %v1517_v6 = vld [vmem:[#allocation8 + $0x24] sm:$0xf] }
  0x48   :  { %726 = vmatpush.bf16.msra.mxu3 %v1380_v53  ;;  %v1533_v53 = vld [vmem:[#allocation8 + $0xa4] sm:$0xf]  ;;  %v1551_v62 = vld [vmem:[#allocation8 + $0x134] sm:$0xf]  ;;  %v1176_v54 = vor.u32 %v1519_v60, %v1173_v61  ;;  %v1397_v1 = vld [vmem:[#allocation8 + $0x1f8] sm:$0xf0] }
  0x49   :  { %704 = vmatpush.bf16.msrb.mxu1 %v1220_v59  ;;  %v1232_v56 = vor.u32 %v1533_v53, %v1229_v55  ;;  %v1340_v59 = vor.u32 %v1562_v58, %v1339_v57  ;;  %v1575_v0 = vld [vmem:[#allocation8 + $0x1f4] sm:$0xf]  ;;  %v1165_v8 = vld [vmem:[#allocation8 + $0x28] sm:$0xf0]  ;;  %v1573_v13 = vld [vmem:[#allocation8 + $0x1e4] sm:$0xf] }
  0x4a   :  { %717 = vmatpush.bf16.msrb.mxu2 %v1284_v63  ;;  %v1301_v63 = vld [vmem:[#allocation8 + $0x138] sm:$0xf0]  ;;  %v1400_v3 = vor.u32 %v1575_v0, %v1397_v1  ;;  %v1531_v4 = vld [vmem:[#allocation8 + $0x94] sm:$0xf]  ;;  %v1389_v14 = vld [vmem:[#allocation8 + $0x1e8] sm:$0xf0] }
  0x4b   :  { %737 = vmatpush.bf16.msrb.mxu0 %v1208_v10  ;;  %v1304_v2 = vor.u32 %v1551_v62, %v1301_v63  ;;  %v1293_v10 = vld [vmem:[#allocation8 + $0x128] sm:$0xf0]  ;;  %v1157_v20 = vld [vmem:[#allocation8 + $0x18] sm:$0xf0]  ;;  %v1547_v21 = vld [vmem:[#allocation8 + $0x114] sm:$0xf] }
  0x4c   :  { %727 = vmatpush.bf16.msra.mxu3 %v1372_v5  ;;  %v1221_v5 = vld [vmem:[#allocation8 + $0x98] sm:$0xf0]  ;;  %v1213_v17 = vld [vmem:[#allocation8 + $0x88] sm:$0xf0]  ;;  %v1571_v24 = vld [vmem:[#allocation8 + $0x1d4] sm:$0xf] }
  0x4d   :  { %705 = vmatpush.bf16.msrb.mxu1 %v1212_v9  ;;  %v1224_v7 = vor.u32 %v1531_v4, %v1221_v5  ;;  %v1549_v9 = vld [vmem:[#allocation8 + $0x124] sm:$0xf]  ;;  %v1285_v23 = vld [vmem:[#allocation8 + $0x118] sm:$0xf0]  ;;  %v1149_v29 = vld [vmem:[#allocation8 + $0x8] sm:$0xf0] }
  0x4e   :  { %718 = vmatpush.bf16.msrb.mxu2 %v1276_v12  ;;  %v1296_v12 = vor.u32 %v1549_v9, %v1293_v10  ;;  %v1381_v25 = vld [vmem:[#allocation8 + $0x1d8] sm:$0xf0]  ;;  %v1545_v30 = vld [vmem:[#allocation8 + $0x104] sm:$0xf]  ;;  %v1277_v32 = vld [vmem:[#allocation8 + $0x108] sm:$0xf0] }
  0x4f   :  { %738 = vmatpush.bf16.msrb.mxu0 %v1200_v26  ;;  %v1288_v26 = vor.u32 %v1547_v21, %v1285_v23  ;;  %v1384_v27 = vor.u32 %v1571_v24, %v1381_v25  ;;  %v1569_v33 = vld [vmem:[#allocation8 + $0x1c4] sm:$0xf]  ;;  %v1280_v35 = vor.u32 %v1545_v30, %v1277_v32  ;;  %v141_v37 = vld [vmem:[#allocation7] sm:$0xf]  ;;  %v1341_v55 = vld [vmem:[#allocation8 + $0x188] sm:$0xf0] }
  0x50   :  { %728 = vmatpush.bf16.msra.mxu3 %v1364_v22  ;;  %v1365_v39 = vld [vmem:[#allocation8 + $0x1b8] sm:$0xf0]  ;;  %v144_v41 = vperm.slane %v141_v37, 1  ;;  %v1565_v42 = vld [vmem:[#allocation8 + $0x1a4] sm:$0xf]  ;;  %v143_v49 = vperm.slane %v141_v37, 0 }
  0x51   :  { %750 = vmatpush.bf16.msra.mxu1 %v1272_v11  ;;  %v1168_v11 = vor.u32 %v1517_v6, %v1165_v8  ;;  %v1349_v47 = vld [vmem:[#allocation8 + $0x198] sm:$0xf0]  ;;  %v145_v51 = vperm.slane %v141_v37, 2  ;;  %v1561_v53 = vld [vmem:[#allocation8 + $0x184] sm:$0xf]  ;;  %v146_v4 = vperm.slane %v141_v37, 3 }
  0x52   :  { %763 = vmatpush.bf16.msra.mxu2 %v1336_v15  ;;  %v1529_v15 = vld [vmem:[#allocation8 + $0x84] sm:$0xf]  ;;  %v1344_v61 = vor.u32 %v1561_v53, %v1341_v55  ;;  %v1584_v10 = vld [vmem:[#allocation10 + $0x38] sm:$0xff]  ;;  %v1587_v24 = vld [vmem:[#allocation10 + $0x50] sm:$0xff] }
  0x53   :  { %739 = vmatpush.bf16.msrb.mxu0 %v1192_v38  ;;  %v1216_v18 = vor.u32 %v1529_v15, %v1213_v17  ;;  %v1567_v38 = vld [vmem:[#allocation8 + $0x1b4] sm:$0xf]  ;;  %v1592_v15 = vld [vmem:[#allocation10 + $0x78] sm:$0xff]  ;;  %v1589_v21 = vld [vmem:[#allocation10 + $0x60] sm:$0xff] }
  0x54   :  { %729 = vmatpush.bf16.msra.mxu3 %v1356_v34  ;;  %v1373_v34 = vld [vmem:[#allocation8 + $0x1c8] sm:$0xf0]  ;;  %v1591_v17 = vld [vmem:[#allocation10 + $0x70] sm:$0xff]  ;;  %v1588_v23 = vld [vmem:[#allocation10 + $0x58] sm:$0xff] }
  0x55   :  { %751 = vmatpush.bf16.msra.mxu1 %v1264_v16  ;;  %v1392_v16 = vor.u32 %v1573_v13, %v1389_v14  ;;  %v1376_v36 = vor.u32 %v1569_v33, %v1373_v34  ;;  %v1581_v13 = vld [vmem:[#allocation10 + $0x20] sm:$0xff]  ;;  %v1580_v14 = vld [vmem:[#allocation10 + $0x18] sm:$0xff] }
  0x56   :  { %764 = vmatpush.bf16.msra.mxu2 %v1328_v28  ;;  %v1513_v28 = vld [vmem:[#allocation8 + $0x4] sm:$0xf]  ;;  %v1600_v34 = vld [vmem:[#allocation11 + $0x38] sm:$0xff] }
  0x57   :  { %740 = vmatpush.bf16.msrb.mxu0 %v1184_v50 }
  0x58   :  { %730 = vmatpush.bf16.msra.mxu3 %v1348_v46  ;;  %v1563_v46 = vld [vmem:[#allocation8 + $0x194] sm:$0xf] }
  0x59   :  { %752 = vmatpush.bf16.msra.mxu1 %v1256_v19  ;;  %v1515_v19 = vld [vmem:[#allocation8 + $0x14] sm:$0xf] }
  0x5a   :  { %765 = vmatpush.bf16.msra.mxu2 %v1320_v40  ;;  %v1160_v22 = vor.u32 %v1515_v19, %v1157_v20  ;;  %v1368_v40 = vor.u32 %v1567_v38, %v1365_v39  ;;  %v1590_v19 = vld [vmem:[#allocation10 + $0x68] sm:$0xff]  ;;  %v1577_v20 = vld [vmem:[#allocation10] sm:$0xff]  ;;  %v1599_v38 = vld [vmem:[#allocation11 + $0x30] sm:$0xff] }
  0x5b   :  { %741 = vmatpush.bf16.msrb.mxu0 %v1176_v54 }
  0x5c   :  { %731 = vmatpush.bf16.msra.mxu3 %v1340_v59 }
  0x5d   :  { %753 = vmatpush.bf16.msra.mxu1 %v1248_v31  ;;  %v1152_v31 = vor.u32 %v1513_v28, %v1149_v29  ;;  %v359_v29 = vld [vmem:[%s1905_s4] sm:$0x3] }
  0x5e   :  { %766 = vmatpush.bf16.msra.mxu2 %v1312_v52  ;;  %v1352_v52 = vor.u32 %v1563_v46, %v1349_v47  ;;  %v361_v32 = vperm.slane %v359_v29, 0  ;;  %v362_v47 = vperm.slane %v359_v29, 1 }
  0x5f   :  { %742 = vmatpush.bf16.msrb.mxu0 %v1168_v11  ;;  %v1583_v11 = vld [vmem:[#allocation10 + $0x30] sm:$0xff] }
  0x60   :  { %776 = vmatpush.bf16.msrb.mxu3 %v1400_v3 }
  0x61   :  { %754 = vmatpush.bf16.msra.mxu1 %v1240_v43  ;;  %v1357_v43 = vld [vmem:[#allocation8 + $0x1a8] sm:$0xf0] }
  0x62   :  { %767 = vmatpush.bf16.msra.mxu2 %v1304_v2  ;;  %v1360_v44 = vor.u32 %v1565_v42, %v1357_v43 }
  0x63   :  { %743 = vmatpush.bf16.msrb.mxu0 %v1160_v22 }
  0x64   :  { %777 = vmatpush.bf16.msrb.mxu3 %v1392_v16  ;;  %v1579_v16 = vld [vmem:[#allocation10 + $0x10] sm:$0xff] }
  0x65   :  { %755 = vmatpush.bf16.msra.mxu1 %v1232_v56 }
  0x66   :  { %768 = vmatpush.bf16.msra.mxu2 %v1296_v12  ;;  %v1582_v12 = vld [vmem:[#allocation10 + $0x28] sm:$0xff] }
  0x67   :  { %744 = vmatpush.bf16.msrb.mxu0 %v1152_v31  ;;  %v1585_v31 = vld [vmem:[#allocation10 + $0x40] sm:$0xff] }
  0x68   :  { %778 = vmatpush.bf16.msrb.mxu3 %v1384_v27  ;;  %v1586_v27 = vld [vmem:[#allocation10 + $0x48] sm:$0xff] }
  0x69   :  { %756 = vmatpush.bf16.msra.mxu1 %v1224_v7 }
  0x6a   :  { %769 = vmatpush.bf16.msra.mxu2 %v1288_v26 }
  0x6c   :  { %779 = vmatpush.bf16.msrb.mxu3 %v1376_v36 }
  0x6d   :  { %757 = vmatpush.bf16.msra.mxu1 %v1216_v18  ;;  %v1578_v18 = vld [vmem:[#allocation10 + $0x8] sm:$0xff] }
  0x6e   :  { %770 = vmatpush.bf16.msra.mxu2 %v1280_v35 }
  0x70   :  { %780 = vmatpush.bf16.msrb.mxu3 %v1368_v40 }
  0x74   :  { %781 = vmatpush.bf16.msrb.mxu3 %v1360_v44 }
  0x78   :  { %782 = vmatpush.bf16.msrb.mxu3 %v1352_v52 }
  0x7c   :  { %783 = vmatpush.bf16.msrb.mxu3 %v1344_v61  ;;  %v1597_v61 = vld [vmem:[#allocation11 + $0x20] sm:$0xff] }
  0xad   :  { %v257_v45 = vpop.f32.mrf.mxu1 }
  0xae   :  { %v258_v48 = vadd.f32 %v257_v45, %v144_v41 }
  0xb0   :  { %v288_v50 = vmax.f32 %v258_v48, 0.0 }
  0xb2   :  { %v292_v56 = vpack.c.bf16 %v288_v50, %v288_v50  ;;  %v244_v57 = vpop.f32.mrf.mxu3 }
  0xb3   :  { %v245_v58 = vadd.f32 %v244_v57, %v143_v49 }
  0xb4   :  { %v270_v59 = vpop.f32.mrf.mxu2  ;;  %706 = vmatmul.bf16.vlgmr.msrb.gmra.mxu1 %v292_v56 }
  0xb5   :  { %v271_v60 = vadd.f32 %v270_v59, %v145_v51  ;;  %v287_v62 = vmax.f32 %v245_v58, 0.0  ;;  %v259_v54 = vpop.f32.mrf.mxu1  ;;  %938 = vmatpush.bf16.msrb.mxu1 %v1592_v15 }
  0xb6   :  { %v1595_v54 = vld [vmem:[#allocation11 + $0x10] sm:$0xff] }
  0xb7   :  { %v289_v63 = vmax.f32 %v271_v60, 0.0  ;;  %v291_v0 = vpack.c.bf16 %v287_v62, %v287_v62  ;;  %v1598_v60 = vld [vmem:[#allocation11 + $0x28] sm:$0xff]  ;;  %v1596_v62 = vld [vmem:[#allocation11 + $0x18] sm:$0xff] }
  0xb9   :  { %v293_v1 = vpack.c.bf16 %v289_v63, %v289_v63  ;;  %693 = vmatmul.bf16.vlgmr.msra.gmra.mxu0 %v291_v0  ;;  %939 = vmatpush.bf16.msrb.mxu1 %v1591_v17  ;;  %v1594_v63 = vld [vmem:[#allocation11 + $0x8] sm:$0xff] }
  0xba   :  { %v246_v2 = vpop.f32.mrf.mxu3  ;;  %925 = vmatpush.bf16.msra.mxu0 %v1584_v10  ;;  %v1615_v10 = vld [vmem:[%s1909_s8] ss:$0 sm:$0xff] }
  0xbb   :  { %719 = vmatmul.bf16.vlgmr.msrb.gmra.mxu2 %v293_v1 }
  0xbc   :  { %v272_v3 = vpop.f32.mrf.mxu2  ;;  %1021 = vmatpush.bf16.msrb.mxu2 %v1600_v34 }
  0xbd   :  { %940 = vmatpush.bf16.msrb.mxu1 %v1590_v19  ;;  %v1614_v3 = vld [vmem:[%s1907_s6] ss:$0 sm:$0xff]  ;;  %s1810_s6 = smov [#allocation13]  }
  0xbe   :  { %926 = vmatpush.bf16.msra.mxu0 %v1583_v11  ;;  %s1062_s8 = sshll.u32 %s1810_s6, 4  ;;  %s1063_s8 = int_to_ptr.vmem [resolvable:$true] %s1062_s8 }
  0xc0   :  { %1022 = vmatpush.bf16.msrb.mxu2 %v1599_v38 }
  0xc1   :  { %941 = vmatpush.bf16.msrb.mxu1 %v1589_v21 }
  0xc2   :  { %v283_v5 = vpop.f32.mrf.mxu3  ;;  %927 = vmatpush.bf16.msra.mxu0 %v1582_v12 }
  0xc3   :  { %v284_v6 = vadd.f32 %v283_v5, %v146_v4 }
  0xc4   :  { %758 = vmatmul.bf16.vlgmr.msra.gmra.mxu1 %v292_v56  ;;  %1023 = vmatpush.bf16.msrb.mxu2 %v1598_v60 }
  0xc5   :  { %v290_v7 = vmax.f32 %v284_v6, 0.0  ;;  %942 = vmatpush.bf16.msrb.mxu1 %v1588_v23 }
  0xc6   :  { %928 = vmatpush.bf16.msra.mxu0 %v1581_v13 }
  0xc7   :  { %v294_v8 = vpack.c.bf16 %v290_v7, %v290_v7 }
  0xc8   :  { %1024 = vmatpush.bf16.msrb.mxu2 %v1597_v61 }
  0xc9   :  { %732 = vmatmul.bf16.vlgmr.msra.gmra.mxu3 %v294_v8  ;;  %745 = vmatmul.bf16.vlgmr.msrb.gmra.mxu0 %v291_v0  ;;  %v1593_v0 = vld [vmem:[#allocation11] sm:$0xff] }
  0xca   :  { %v285_v9 = vpop.f32.mrf.mxu3  ;;  %929 = vmatpush.bf16.msra.mxu0 %v1580_v14  ;;  %943 = vmatpush.bf16.msrb.mxu1 %v1587_v24 }
  0xcb   :  { %771 = vmatmul.bf16.vlgmr.msra.gmra.mxu2 %v293_v1 }
  0xcc   :  { %1025 = vmatpush.bf16.msrb.mxu2 %v1596_v62 }
  0xce   :  { %930 = vmatpush.bf16.msra.mxu0 %v1579_v16  ;;  %944 = vmatpush.bf16.msrb.mxu1 %v1586_v27 }
  0xd0   :  { %1026 = vmatpush.bf16.msrb.mxu2 %v1595_v54 }
  0xd2   :  { %931 = vmatpush.bf16.msra.mxu0 %v1578_v18  ;;  %945 = vmatpush.bf16.msrb.mxu1 %v1585_v31 }
  0xd4   :  { %1027 = vmatpush.bf16.msrb.mxu2 %v1594_v63 }
  0xd6   :  { %932 = vmatpush.bf16.msra.mxu0 %v1577_v20 }
  0xd8   :  { %1028 = vmatpush.bf16.msrb.mxu2 %v1593_v0 }
  0xd9   :  { %784 = vmatmul.bf16.vlgmr.msrb.gmra.mxu3 %v294_v8 }
 0x131   :  { %v707_v22 = vpop.f32.mrf.mxu1 }
 0x136   :  { %v694_v25 = vpop.f32.mrf.mxu0 }
 0x137   :  { %v695_v35 = vadd.f32 %v694_v25, %v361_v32 }
 0x139   :  { %v709_v26 = vpop.f32.mrf.mxu1  ;;  %v708_v39 = vadd.f32 %v707_v22, %v695_v35 }
 0x13e   :  { %v720_v28 = vpop.f32.mrf.mxu2  ;;  %v696_v30 = vpop.f32.mrf.mxu0 }
 0x13f   :  { %v721_v41 = vadd.f32 %v720_v28, %v708_v39 }
 0x141   :  { %v759_v33 = vpop.f32.mrf.mxu1 }
 0x146   :  { %v722_v36 = vpop.f32.mrf.mxu2  ;;  %v746_v37 = vpop.f32.mrf.mxu0 }
 0x147   :  { %v747_v50 = vadd.f32 %v746_v37, %v362_v47 }
 0x149   :  { %v761_v40 = vpop.f32.mrf.mxu1  ;;  %v760_v52 = vadd.f32 %v759_v33, %v747_v50 }
 0x14c   :  { %v733_v42 = vpop.f32.mrf.mxu3 }
 0x14d   :  { %v734_v43 = vadd.f32 %v733_v42, %v721_v41 }
 0x14e   :  { %v772_v44 = vpop.f32.mrf.mxu2  ;;  %v748_v45 = vpop.f32.mrf.mxu0 }
 0x14f   :  { %v789_v46 = vmax.f32 %v734_v43, 0.0  ;;  %v773_v53 = vadd.f32 %v772_v44, %v760_v52 }
 0x151   :  { %v791_v48 = vpack.c.bf16 %v789_v46, %v789_v46 }
 0x153   :  { %933 = vmatmul.bf16.vlgmr.msra.gmra.mxu0 %v791_v48 }
 0x154   :  { %v735_v49 = vpop.f32.mrf.mxu3 }
 0x156   :  { %v774_v51 = vpop.f32.mrf.mxu2 }
 0x15c   :  { %v785_v55 = vpop.f32.mrf.mxu3 }
 0x15d   :  { %v786_v56 = vadd.f32 %v785_v55, %v773_v53 }
 0x15f   :  { %v790_v57 = vmax.f32 %v786_v56, 0.0 }
 0x161   :  { %v792_v58 = vpack.c.bf16 %v790_v57, %v790_v57 }
 0x163   :  { %946 = vmatmul.bf16.vlgmr.msrb.gmra.mxu1 %v792_v58 }
 0x164   :  { %v787_v59 = vpop.f32.mrf.mxu3 }
 0x1d0   :  { %v934_v1 = vpop.f32.mrf.mxu0 }
 0x1d1   :  { %v935_v4 = vadd.f32 %v1614_v3, %v934_v1 }
 0x1d8   :  { %v936_v2 = vpop.f32.mrf.mxu0 }
 0x1e0   :  { %v947_v5 = vpop.f32.mrf.mxu1 }
 0x1e1   :  { %v948_v6 = vadd.f32 %v947_v5, %v935_v4 }
 0x1e3   :  { %v951_v7 = vmax.f32 %v948_v6, 0.0 }
 0x1e5   :  { %v952_v8 = vpack.c.bf16 %v951_v7, %v951_v7 }
 0x1e7   :  { %1029 = vmatmul.bf16.vlgmr.msrb.gmra.mxu2 %v952_v8 }
 0x1e8   :  { %v949_v9 = vpop.f32.mrf.mxu1 }
 0x26a   :  { %v1030_v11 = vpop.f32.mrf.mxu2 }
 0x26b   :  { %v1031_v12 = vadd.f32 %v1615_v10, %v1030_v11 }
 0x26d   :  { %1034 = vmax.xlane.f32.xlu0 %v1031_v12 }
 0x272   :  { %v1032_v13 = vpop.f32.mrf.mxu2 }
 0x2e0   :  { %v1035_v14 = vpop.xlane.xlu0 %1034 }
 0x2e1   :  { %v1036_v15 = vsub.f32 %v1031_v12, %v1035_v14 }
 0x2e3   :  { %v1037_v16 = vmul.f32 1.442695, %v1036_v15 }
 0x2e5   :  { %1616 = vpow2.f32 %v1037_v16 }
 0x2eb   :  { %v1617_v17 = vpop.eup %1616 }
 0x2ec   :  { %1039 = vadd.xlane.f32.xlu0 %v1617_v17 }
 0x35f   :  { %v1040_v18 = vpop.xlane.xlu0 %1039 }
 0x360   :  { %1618 = vrcp.f32 %v1040_v18  ;;  %v1052_v22 = vand.u32 2147483648, %v1040_v18  ;;  %v1050_v24 = vand.u32 2147483647, %v1040_v18  ;;  %vm1046_vm2 = vweird.f32 %v1040_v18 }
 0x362   :  { %v1053_v26 = vor.u32 1.1754944e-38, %v1052_v22  ;;  %vm1051_vm4 = vcmp.eq.f32.partialorder %v1050_v24, 8.507059e+37 }
 0x366   :  { %v1619_v19 = vpop.eup %1618 }
 0x367   :  { %v1042_v20 = vmul.f32 %v1619_v19, %v1040_v18  ;;  %vm1047_vm1 = vweird.f32 %v1619_v19 }
 0x368   :  { %vm1048_vm3 = vmor %vm1046_vm2, %vm1047_vm1 }
 0x369   :  { %v1043_v21 = vsub.f32 1.0, %v1042_v20 }
 0x36b   :  { %v1044_v23 = vmul.f32 %v1619_v19, %v1043_v21 }
 0x36d   :  { %v1045_v25 = vadd.f32 %v1619_v19, %v1044_v23 }
 0x36f   :  { %v1049_v27 = vsel %vm1048_vm3, %v1619_v19, %v1045_v25 }
 0x370   :  { %v1054_v28 = vsel %vm1051_vm4, %v1053_v26, %v1049_v27 }
 0x371   :  { %v1055_v29 = vmul.f32 %v1617_v17, %v1054_v28 }
 0x373   :  { %1056 = vst [vmem:[#allocation13] sm:$0xff] %v1055_v29 }
 0x374   :  { %1067 = dma.vmem_to_hbm [thread:$0]  %s1063_s8, 128, %s1065_s24, [#allocation4]  }
 0x375   :  { %1796 = dma.done.wait [#allocation4], 128  }
 0x376   :  { %1797 = vsyncadd [#allocation4], 4294967168 }
 0x377   :  { %1072 = vsyncpa [#allocation3], 1 }
 0x378   :  { %1073 = vsyncpa [#allocation6], 1 }
 0x379   :  { %1074 = vsyncpa [#allocation9], 1 }
 0x37a   :  { %1075 = vsyncpa [#allocation12], 1 }
 0x37b   :  { %1076 = vsyncpa [#allocation4], 1 }

</bundles_post_ra>
